<compile_context>
chip_gen: v5e
topology: v5e:2x2
jax: 0.10.0
libtpu: 0.0.40
codegen_flags: <defaults>
</compile_context>

<pallas_src>
import functools
from typing import List

import jax
import jax.numpy as jnp
from jax.experimental import pallas as pl
from jax.experimental.pallas import tpu as pltpu


def _round_up(n: int, m: int) -> int:
    return ((n + m - 1) // m) * m


def _make_mlp_kernel(num_layers: int):
    """Kernel refs = (x_packed, t_packed, w1x, w1t, b1, w2, b2, ..., wL, bL, out)."""

    def kernel(*refs):
        x_ref, t_ref = refs[0], refs[1]
        o_ref = refs[-1]
        p = refs[2:-1]

        w1x_ref, w1t_ref, b1_ref = p[0], p[1], p[2]
        wdt = w1x_ref.dtype

        # First Linear with the time column folded in (block-diag packed):
        #   [x | t] @ W1 + b1 == x_p @ bd(W1[:dim]) + t_p @ bd(W1[dim]) + b1_t
        h = jnp.dot(x_ref[...].astype(wdt), w1x_ref[...],
                    preferred_element_type=jnp.float32)
        h = h + jnp.dot(t_ref[...].astype(wdt), w1t_ref[...],
                        preferred_element_type=jnp.float32)
        h = h + b1_ref[...].astype(jnp.float32)

        for i in range(1, num_layers):
            # SiLU between layers (never after the last layer), kept in f32.
            h = h * jax.nn.sigmoid(h)
            w_ref = p[1 + 2 * i]
            b_ref = p[2 + 2 * i]
            h = jnp.dot(h.astype(w_ref.dtype), w_ref[...],
                        preferred_element_type=jnp.float32)
            h = h + b_ref[...].astype(jnp.float32)

        o_ref[...] = h.astype(o_ref.dtype)

    return kernel


def init_mlp_params(key, dims: List[int], dtype=jnp.float32):
    """Deterministic init matching torch.nn.Linear's U(-1/sqrt(in), 1/sqrt(in))."""
    params = []
    for i in range(len(dims) - 1):
        fan_in, fan_out = dims[i], dims[i + 1]
        key, kw, kb = jax.random.split(key, 3)
        bound = 1.0 / (fan_in ** 0.5)
        w = jax.random.uniform(kw, (fan_in, fan_out), dtype, -bound, bound)
        b = jax.random.uniform(kb, (1, fan_out), dtype, -bound, bound)
        params.append((w, b))
    return params


@functools.partial(jax.jit,
                   static_argnames=("dim", "block_rows", "weights_dtype"))
def mlp_score_forward(x, t, params, *, dim, block_rows=4096,
                      weights_dtype=None):
    """
    Args:
      x: (bs, dim)
      t: (bs, 1)
      params: list of (W (in, out), b (1, out)); first W has in = dim + 1.
      block_rows: batch-tile size in ORIGINAL rows (swept by callers).
      weights_dtype: optional compute dtype for weights (e.g. jnp.bfloat16 for
        the native MXU path on v5e/v6e/v7x); None keeps the params' dtype.
    Returns:
      (bs, dim) score prediction.
    """
    bs = x.shape[0]
    num_layers = len(params)
    out_dtype = x.dtype

    # ---- lane-packing factor: pack rows until the widest layer fills 128 lanes.
    max_width = max([w.shape[1] for (w, _) in params] + [dim])
    pack = max(1, 128 // max_width)

    wdt = weights_dtype if weights_dtype is not None else params[0][0].dtype
    eye = jnp.eye(pack, dtype=jnp.float32)

    def block_diag(w):                       # W (in, out) -> (pack*in, pack*out)
        return jnp.kron(eye, w.astype(jnp.float32)).astype(wdt)

    def tile_bias(b):                        # b (1, out) -> (1, pack*out), f32
        return jnp.tile(b.astype(jnp.float32), (1, pack))

    (w1, b1) = params[0]
    flat_params = [block_diag(w1[:dim, :]),          # acts on packed x
                   block_diag(w1[dim:dim + 1, :]),   # acts on packed t
                   tile_bias(b1)]
    for (w, b) in params[1:]:
        flat_params.append(block_diag(w))
        flat_params.append(tile_bias(b))

    # ---- batch padding & row tiling on PACKED rows (multiples of 8 sublanes).
    rows = pl.cdiv(bs, pack)
    tm_cap = max(8, _round_up(max(1, block_rows // pack), 8))
    # Keep at least 2 grid steps when the batch allows it, so the "parallel"
    # axis can be sharded across both TensorCores on v7x.
    tm = min(tm_cap, max(8, _round_up(pl.cdiv(rows, 2), 8)))
    rows_pad = _round_up(rows, tm)
    bs_pad = rows_pad * pack

    if bs_pad != bs:
        x = jnp.pad(x, ((0, bs_pad - bs), (0, 0)))
        t = jnp.pad(t, ((0, bs_pad - bs), (0, 0)))
    xp = x.reshape(rows_pad, pack * dim)     # free row-major views
    tp = t.reshape(rows_pad, pack)

    grid = (rows_pad // tm,)

    x_spec = pl.BlockSpec((tm, pack * dim), lambda i: (i, 0))
    t_spec = pl.BlockSpec((tm, pack), lambda i: (i, 0))
    # Parameters: whole-array blocks, VMEM-resident; constant index_map means
    # they are only DMA'd once across the batch grid.
    param_specs = [pl.BlockSpec(p.shape, lambda i: (0, 0)) for p in flat_params]
    out_spec = pl.BlockSpec((tm, pack * dim), lambda i: (i, 0))

    # ---- advisory cost estimate (original, unpacked arithmetic).
    layer_dims = [(w.shape[0], w.shape[1]) for (w, _) in params]
    flops = 2 * bs_pad * sum(i * o for i, o in layer_dims)
    transcendentals = bs_pad * sum(o for _, o in layer_dims[:-1])
    bytes_accessed = (xp.size * xp.dtype.itemsize
                      + tp.size * tp.dtype.itemsize
                      + rows_pad * pack * dim * jnp.dtype(out_dtype).itemsize
                      + sum(p.size * p.dtype.itemsize for p in flat_params))
    cost = pl.CostEstimate(flops=flops, transcendentals=transcendentals,
                           bytes_accessed=bytes_accessed)

    out = pl.pallas_call(
        _make_mlp_kernel(num_layers),
        out_shape=jax.ShapeDtypeStruct((rows_pad, pack * dim), out_dtype),
        grid=grid,
        in_specs=[x_spec, t_spec] + param_specs,
        out_specs=out_spec,
        compiler_params=pltpu.CompilerParams(
            dimension_semantics=("parallel",)),
        cost_estimate=cost,
    )(xp, tp, *flat_params)

    out = out.reshape(bs_pad, dim)
    if bs_pad != bs:
        out = out[:bs]
    return out


def _reference_forward(x, t, params):
    h = jnp.concatenate([x, t], axis=-1).astype(jnp.float32)
    for i, (w, b) in enumerate(params):
        h = h @ w.astype(jnp.float32) + b.astype(jnp.float32).reshape(1, -1)
        if i < len(params) - 1:
            h = h * jax.nn.sigmoid(h)
    return h


if __name__ == "__main__":
    dim = 4
    hiddens = [32, 32]
    dims = [dim + 1] + hiddens + [dim]

    key = jax.random.PRNGKey(0)
    key, kx, kt, kp = jax.random.split(key, 4)
    params = init_mlp_params(kp, dims, jnp.float32)

    # --- small case (single tile), f32 weights ---
    bs = 8
    x = jax.random.normal(kx, (bs, dim), jnp.float32)
    t = jax.random.uniform(kt, (bs, 1), jnp.float32)

    out = jax.block_until_ready(mlp_score_forward(x, t, params, dim=dim))
    ref = _reference_forward(x, t, params)
    assert out.shape == (bs, dim), out.shape
    assert jnp.allclose(out, ref, atol=5e-3, rtol=5e-3), "mismatch vs reference"

    # --- non-multiple batch exercising padding + a multi-step batch grid ---
    key, kx2, kt2 = jax.random.split(key, 3)
    bs2 = 100
    x2 = jax.random.normal(kx2, (bs2, dim), jnp.float32)
    t2 = jax.random.uniform(kt2, (bs2, 1), jnp.float32)

    out2 = jax.block_until_ready(
        mlp_score_forward(x2, t2, params, dim=dim, block_rows=32))
    ref2 = _reference_forward(x2, t2, params)
    assert out2.shape == (bs2, dim), out2.shape
    assert jnp.allclose(out2, ref2, atol=5e-3, rtol=5e-3), \
        "mismatch vs reference (grid)"

    # --- bf16-weight MXU path (looser tolerance for bf16 rounding) ---
    key, kx3, kt3 = jax.random.split(key, 3)
    bs3 = 257
    x3 = jax.random.normal(kx3, (bs3, dim), jnp.float32)
    t3 = jax.random.uniform(kt3, (bs3, 1), jnp.float32)

    out3 = jax.block_until_ready(
        mlp_score_forward(x3, t3, params, dim=dim,
                          weights_dtype=jnp.bfloat16))
    ref3 = _reference_forward(x3, t3, params)
    assert out3.shape == (bs3, dim), out3.shape
    assert jnp.allclose(out3, ref3, atol=5e-2, rtol=5e-2), \
        "mismatch vs reference (bf16)"

    print("KERNEL_OK")
</pallas_src>

<mosaic_0001>
module attributes {stable_mosaic.version = 11 : i64} {
  func.func @kernel(%arg0: i32, %arg1: memref<8x16xf32, #tpu.memory_space<vmem>>, %arg2: memref<8x4xf32, #tpu.memory_space<vmem>>, %arg3: memref<16x128xf32, #tpu.memory_space<vmem>>, %arg4: memref<4x128xf32, #tpu.memory_space<vmem>>, %arg5: memref<1x128xf32, #tpu.memory_space<vmem>>, %arg6: memref<128x128xf32, #tpu.memory_space<vmem>>, %arg7: memref<1x128xf32, #tpu.memory_space<vmem>>, %arg8: memref<128x16xf32, #tpu.memory_space<vmem>>, %arg9: memref<1x16xf32, #tpu.memory_space<vmem>>, %arg10: memref<8x16xf32, #tpu.memory_space<vmem>>) attributes {dimension_semantics = [#tpu.dimension_semantics<parallel>], iteration_bounds = array<i64: 1>, scalar_prefetch = 0 : i64, scratch_operands = 0 : i64, tpu.core_type = #tpu.core_type<tc>, window_params = [{transform_indices = @transform_0, window_bounds = array<i64: 8, 16>}, {transform_indices = @transform_1, window_bounds = array<i64: 8, 4>}, {pipeline_mode = #tpu.pipeline_mode<synchronous>, transform_indices = @transform_2, window_bounds = array<i64: 16, 128>}, {pipeline_mode = #tpu.pipeline_mode<synchronous>, transform_indices = @transform_3, window_bounds = array<i64: 4, 128>}, {pipeline_mode = #tpu.pipeline_mode<synchronous>, transform_indices = @transform_4, window_bounds = array<i64: 1, 128>}, {pipeline_mode = #tpu.pipeline_mode<synchronous>, transform_indices = @transform_5, window_bounds = array<i64: 128, 128>}, {pipeline_mode = #tpu.pipeline_mode<synchronous>, transform_indices = @transform_6, window_bounds = array<i64: 1, 128>}, {pipeline_mode = #tpu.pipeline_mode<synchronous>, transform_indices = @transform_7, window_bounds = array<i64: 128, 16>}, {pipeline_mode = #tpu.pipeline_mode<synchronous>, transform_indices = @transform_8, window_bounds = array<i64: 1, 16>}, {transform_indices = @transform_9, window_bounds = array<i64: 8, 16>}]} {
    %c0 = arith.constant 0 : index
    %c0_0 = arith.constant 0 : index
    %0 = vector.load %arg1[%c0, %c0_0] : memref<8x16xf32, #tpu.memory_space<vmem>>, vector<8x16xf32>
    %c0_1 = arith.constant 0 : index
    %c0_2 = arith.constant 0 : index
    %1 = vector.load %arg3[%c0_1, %c0_2] : memref<16x128xf32, #tpu.memory_space<vmem>>, vector<16x128xf32>
    %cst = arith.constant dense<0.000000e+00> : vector<8x128xf32>
    %2 = tpu.matmul %0, %1, %cst {dimension_numbers = #tpu.dot_dimension_numbers<[1], [0], [0], [1], [0, 0, 1, 1], [], []>} : vector<8x16xf32>, vector<16x128xf32>, vector<8x128xf32> -> vector<8x128xf32>
    %c0_3 = arith.constant 0 : index
    %c0_4 = arith.constant 0 : index
    %3 = vector.load %arg2[%c0_3, %c0_4] : memref<8x4xf32, #tpu.memory_space<vmem>>, vector<8x4xf32>
    %c0_5 = arith.constant 0 : index
    %c0_6 = arith.constant 0 : index
    %4 = vector.load %arg4[%c0_5, %c0_6] : memref<4x128xf32, #tpu.memory_space<vmem>>, vector<4x128xf32>
    %cst_7 = arith.constant dense<0.000000e+00> : vector<8x128xf32>
    %5 = tpu.matmul %3, %4, %cst_7 {dimension_numbers = #tpu.dot_dimension_numbers<[1], [0], [0], [1], [0, 0, 1, 1], [], []>} : vector<8x4xf32>, vector<4x128xf32>, vector<8x128xf32> -> vector<8x128xf32>
    %6 = arith.addf %2, %5 : vector<8x128xf32>
    %c0_8 = arith.constant 0 : index
    %c0_9 = arith.constant 0 : index
    %7 = vector.load %arg5[%c0_8, %c0_9] : memref<1x128xf32, #tpu.memory_space<vmem>>, vector<1x128xf32>
    %8 = vector.broadcast %7 : vector<1x128xf32> to vector<8x128xf32>
    %9 = arith.addf %6, %8 : vector<8x128xf32>
    %10 = arith.negf %9 : vector<8x128xf32>
    %11 = math.exp %10 : vector<8x128xf32>
    %cst_10 = arith.constant 1.000000e+00 : f32
    %12 = vector.broadcast %cst_10 : f32 to vector<8x128xf32>
    %13 = arith.addf %12, %11 : vector<8x128xf32>
    %14 = arith.divf %12, %13 : vector<8x128xf32>
    %15 = arith.mulf %9, %14 : vector<8x128xf32>
    %c0_11 = arith.constant 0 : index
    %c0_12 = arith.constant 0 : index
    %16 = vector.load %arg6[%c0_11, %c0_12] : memref<128x128xf32, #tpu.memory_space<vmem>>, vector<128x128xf32>
    %cst_13 = arith.constant dense<0.000000e+00> : vector<8x128xf32>
    %17 = tpu.matmul %15, %16, %cst_13 {dimension_numbers = #tpu.dot_dimension_numbers<[1], [0], [0], [1], [0, 0, 1, 1], [], []>} : vector<8x128xf32>, vector<128x128xf32>, vector<8x128xf32> -> vector<8x128xf32>
    %c0_14 = arith.constant 0 : index
    %c0_15 = arith.constant 0 : index
    %18 = vector.load %arg7[%c0_14, %c0_15] : memref<1x128xf32, #tpu.memory_space<vmem>>, vector<1x128xf32>
    %19 = vector.broadcast %18 : vector<1x128xf32> to vector<8x128xf32>
    %20 = arith.addf %17, %19 : vector<8x128xf32>
    %21 = arith.negf %20 : vector<8x128xf32>
    %22 = math.exp %21 : vector<8x128xf32>
    %cst_16 = arith.constant 1.000000e+00 : f32
    %23 = vector.broadcast %cst_16 : f32 to vector<8x128xf32>
    %24 = arith.addf %23, %22 : vector<8x128xf32>
    %25 = arith.divf %23, %24 : vector<8x128xf32>
    %26 = arith.mulf %20, %25 : vector<8x128xf32>
    %c0_17 = arith.constant 0 : index
    %c0_18 = arith.constant 0 : index
    %27 = vector.load %arg8[%c0_17, %c0_18] : memref<128x16xf32, #tpu.memory_space<vmem>>, vector<128x16xf32>
    %cst_19 = arith.constant dense<0.000000e+00> : vector<8x16xf32>
    %28 = tpu.matmul %26, %27, %cst_19 {dimension_numbers = #tpu.dot_dimension_numbers<[1], [0], [0], [1], [0, 0, 1, 1], [], []>} : vector<8x128xf32>, vector<128x16xf32>, vector<8x16xf32> -> vector<8x16xf32>
    %c0_20 = arith.constant 0 : index
    %c0_21 = arith.constant 0 : index
    %29 = vector.load %arg9[%c0_20, %c0_21] : memref<1x16xf32, #tpu.memory_space<vmem>>, vector<1x16xf32>
    %30 = vector.broadcast %29 : vector<1x16xf32> to vector<8x16xf32>
    %31 = arith.addf %28, %30 : vector<8x16xf32>
    %c0_22 = arith.constant 0 : index
    %c0_23 = arith.constant 0 : index
    %32 = vector.load %arg10[%c0_22, %c0_23] : memref<8x16xf32, #tpu.memory_space<vmem>>, vector<8x16xf32>
    tpu.vector_store %arg10[%c0_22, %c0_23], %31 {strides = array<i32>} : memref<8x16xf32, #tpu.memory_space<vmem>>, vector<8x16xf32>,
    return
  }
  func.func @transform_0(%arg0: i32) -> (i32, i32) {
    %c0_i32 = arith.constant 0 : i32
    %c0_i32_0 = arith.constant 0 : i32
    return %arg0, %c0_i32 : i32, i32
  }
  func.func @transform_1(%arg0: i32) -> (i32, i32) {
    %c0_i32 = arith.constant 0 : i32
    %c0_i32_0 = arith.constant 0 : i32
    return %arg0, %c0_i32 : i32, i32
  }
  func.func @transform_2(%arg0: i32) -> (i32, i32) {
    %c0_i32 = arith.constant 0 : i32
    %c0_i32_0 = arith.constant 0 : i32
    %c0_i32_1 = arith.constant 0 : i32
    return %c0_i32, %c0_i32_0 : i32, i32
  }
  func.func @transform_3(%arg0: i32) -> (i32, i32) {
    %c0_i32 = arith.constant 0 : i32
    %c0_i32_0 = arith.constant 0 : i32
    %c0_i32_1 = arith.constant 0 : i32
    return %c0_i32, %c0_i32_0 : i32, i32
  }
  func.func @transform_4(%arg0: i32) -> (i32, i32) {
    %c0_i32 = arith.constant 0 : i32
    %c0_i32_0 = arith.constant 0 : i32
    %c0_i32_1 = arith.constant 0 : i32
    return %c0_i32, %c0_i32_0 : i32, i32
  }
  func.func @transform_5(%arg0: i32) -> (i32, i32) {
    %c0_i32 = arith.constant 0 : i32
    %c0_i32_0 = arith.constant 0 : i32
    %c0_i32_1 = arith.constant 0 : i32
    return %c0_i32, %c0_i32_0 : i32, i32
  }
  func.func @transform_6(%arg0: i32) -> (i32, i32) {
    %c0_i32 = arith.constant 0 : i32
    %c0_i32_0 = arith.constant 0 : i32
    %c0_i32_1 = arith.constant 0 : i32
    return %c0_i32, %c0_i32_0 : i32, i32
  }
  func.func @transform_7(%arg0: i32) -> (i32, i32) {
    %c0_i32 = arith.constant 0 : i32
    %c0_i32_0 = arith.constant 0 : i32
    %c0_i32_1 = arith.constant 0 : i32
    return %c0_i32, %c0_i32_0 : i32, i32
  }
  func.func @transform_8(%arg0: i32) -> (i32, i32) {
    %c0_i32 = arith.constant 0 : i32
    %c0_i32_0 = arith.constant 0 : i32
    %c0_i32_1 = arith.constant 0 : i32
    return %c0_i32, %c0_i32_0 : i32, i32
  }
  func.func @transform_9(%arg0: i32) -> (i32, i32) {
    %c0_i32 = arith.constant 0 : i32
    %c0_i32_0 = arith.constant 0 : i32
    return %arg0, %c0_i32 : i32, i32
  }
}

</mosaic_0001>

<bundles_post_ra>
// kernel: mlp_score_forward.1
= control target key start
LH: loop header
LB: loop body
LE: loop exit
PB: predicated region body
PF: predicated region fallthrough
CT: control target
= control target key end

     0   :  { %vm41_vm0 = vcmask 1043456   ;;  %vm37_vm1 = vcmask 31744   ;;  %vm65_vm2 = vcmask 130048   ;;  %s410_s2 = inlined_call_operand.vmem [shape: f32[16,128], index: 2, kind: input, shape index: {}]   ;;  %s411_s3 = inlined_call_operand.vmem [shape: f32[4,128], index: 3, kind: input, shape index: {}]   ;;  %s412_s1 = inlined_call_operand.vmem [shape: f32[8,4], index: 1, kind: input, shape index: {}]   ;;  %s413_s0 = inlined_call_operand.vmem [shape: f32[8,16], index: 0, kind: input, shape index: {}]   ;;  %s414_s4 = inlined_call_operand.vmem [shape: f32[1,128], index: 4, kind: input, shape index: {}]   ;;  %s415_s6 = inlined_call_operand.vmem [shape: f32[1,128], index: 6, kind: input, shape index: {}]   ;;  %s416_s5 = inlined_call_operand.vmem [shape: f32[128,128], index: 5, kind: input, shape index: {}]   ;;  %s417_s8 = inlined_call_operand.vmem [shape: f32[1,16], index: 8, kind: input, shape index: {}]   ;;  %s418_s7 = inlined_call_operand.vmem [shape: f32[128,16], index: 7, kind: input, shape index: {}]   ;;  %s419_s9 = inlined_call_operand.vmem [shape: f32[8,16], index: 9, kind: output, shape index: {}]  }
   0x1   :  { %v34_v0 = vld [vmem:[%s410_s2 + $0x8] sm:$0xff]  ;;  %v36_v1 = vld [vmem:[%s411_s3] sm:$0xf]  ;;  %v129_v5 = vld [vmem:[%s416_s5 + $0x78] sm:$0xff] }
   0x2   :  { %v33_v2 = vld [vmem:[%s410_s2] sm:$0xff]  ;;  %83 = vmatpush.msra.mxu1 %v34_v0  ;;  %219 = vmatpush.msk.msra.mxu0 %vm41_vm0, %v36_v1  ;;  %v128_v6 = vld [vmem:[%s416_s5 + $0x70] sm:$0xff]  ;;  %v127_v7 = vld [vmem:[%s416_s5 + $0x68] sm:$0xff] }
   0x3   :  { %v35_v3 = vld [vmem:[%s412_s1] sm:$0xff]  ;;  %134 = vmatpush.msra.mxu2 %v129_v5  ;;  %v125_v9 = vld [vmem:[%s416_s5 + $0x58] sm:$0xff]  ;;  %v124_v10 = vld [vmem:[%s416_s5 + $0x50] sm:$0xff] }
   0x4   :  { %v32_v4 = vld [vmem:[%s413_s0] sm:$0xff]  ;;  %220 = vmatmul.msk.f32.vlgmr.msra.gmra.mxu0 %vm37_vm1, %v35_v3  ;;  %84 = vmatpush.msra.mxu1 %v33_v2  ;;  %v123_v11 = vld [vmem:[%s416_s5 + $0x48] sm:$0xff]  ;;  %v121_v13 = vld [vmem:[%s416_s5 + $0x38] sm:$0xff] }
   0x5   :  { %221 = vmatmul.msk.f32.vlgmr.msra.gmra.mxu1 %vm65_vm2, %v32_v4  ;;  %135 = vmatpush.msra.mxu2 %v128_v6  ;;  %v126_v8 = vld [vmem:[%s416_s5 + $0x60] sm:$0xff]  ;;  %v120_v14 = vld [vmem:[%s416_s5 + $0x30] sm:$0xff]  ;;  %v119_v15 = vld [vmem:[%s416_s5 + $0x28] sm:$0xff] }
   0x6   :  { %v122_v12 = vld [vmem:[%s416_s5 + $0x40] sm:$0xff]  ;;  %v117_v17 = vld [vmem:[%s416_s5 + $0x18] sm:$0xff]  ;;  %v116_v18 = vld [vmem:[%s416_s5 + $0x10] sm:$0xff] }
   0x7   :  { %136 = vmatpush.msra.mxu2 %v127_v7  ;;  %v118_v16 = vld [vmem:[%s416_s5 + $0x20] sm:$0xff]  ;;  %v115_v19 = vld [vmem:[%s416_s5 + $0x8] sm:$0xff]  ;;  %v189_v40 = vld [vmem:[%s418_s7 + $0x78] sm:$0xff] }
   0x8   :  { %v224_v21 = vld [vmem:[%s414_s4] ss:$0 sm:$0xff]  ;;  %194 = vmatpush.msra.mxu3 %v189_v40  ;;  %v188_v41 = vld [vmem:[%s418_s7 + $0x70] sm:$0xff]  ;;  %v187_v42 = vld [vmem:[%s418_s7 + $0x68] sm:$0xff] }
   0x9   :  { %137 = vmatpush.msra.mxu2 %v126_v8  ;;  %v114_v22 = vld [vmem:[%s416_s5] sm:$0xff]  ;;  %v185_v44 = vld [vmem:[%s418_s7 + $0x58] sm:$0xff]  ;;  %v184_v45 = vld [vmem:[%s418_s7 + $0x50] sm:$0xff] }
   0xa   :  { %195 = vmatpush.msra.mxu3 %v188_v41  ;;  %v186_v43 = vld [vmem:[%s418_s7 + $0x60] sm:$0xff]  ;;  %v183_v46 = vld [vmem:[%s418_s7 + $0x48] sm:$0xff]  ;;  %v181_v48 = vld [vmem:[%s418_s7 + $0x38] sm:$0xff] }
   0xb   :  { %138 = vmatpush.msra.mxu2 %v125_v9  ;;  %v182_v47 = vld [vmem:[%s418_s7 + $0x40] sm:$0xff]  ;;  %v180_v49 = vld [vmem:[%s418_s7 + $0x30] sm:$0xff]  ;;  %v179_v50 = vld [vmem:[%s418_s7 + $0x28] sm:$0xff] }
   0xc   :  { %196 = vmatpush.msra.mxu3 %v187_v42  ;;  %v178_v51 = vld [vmem:[%s418_s7 + $0x20] sm:$0xff]  ;;  %v177_v52 = vld [vmem:[%s418_s7 + $0x18] sm:$0xff]  ;;  %v176_v53 = vld [vmem:[%s418_s7 + $0x10] sm:$0xff] }
   0xd   :  { %139 = vmatpush.msra.mxu2 %v124_v10  ;;  %v175_v54 = vld [vmem:[%s418_s7 + $0x8] sm:$0xff]  ;;  %v225_v55 = vld [vmem:[%s415_s6] ss:$0 sm:$0xff] }
   0xe   :  { %197 = vmatpush.msra.mxu3 %v186_v43  ;;  %v174_v56 = vld [vmem:[%s418_s7] sm:$0xff] }
   0xf   :  { %140 = vmatpush.msra.mxu2 %v123_v11  ;;  %v226_v9 = vld [vmem:[%s417_s8] ss:$0 sm:$0xff] }
  0x10   :  { %198 = vmatpush.msra.mxu3 %v185_v44 }
  0x11   :  { %141 = vmatpush.msra.mxu2 %v122_v12 }
  0x12   :  { %199 = vmatpush.msra.mxu3 %v184_v45 }
  0x13   :  { %142 = vmatpush.msra.mxu2 %v121_v13 }
  0x14   :  { %200 = vmatpush.msra.mxu3 %v183_v46 }
  0x15   :  { %143 = vmatpush.msra.mxu2 %v120_v14 }
  0x16   :  { %201 = vmatpush.msra.mxu3 %v182_v47 }
  0x17   :  { %144 = vmatpush.msra.mxu2 %v119_v15 }
  0x18   :  { %202 = vmatpush.msra.mxu3 %v181_v48 }
  0x19   :  { %145 = vmatpush.msra.mxu2 %v118_v16 }
  0x1a   :  { %203 = vmatpush.msra.mxu3 %v180_v49 }
  0x1b   :  { %146 = vmatpush.msra.mxu2 %v117_v17 }
  0x1c   :  { %204 = vmatpush.msra.mxu3 %v179_v50 }
  0x1d   :  { %147 = vmatpush.msra.mxu2 %v116_v18 }
  0x1e   :  { %205 = vmatpush.msra.mxu3 %v178_v51 }
  0x1f   :  { %148 = vmatpush.msra.mxu2 %v115_v19 }
  0x20   :  { %206 = vmatpush.msra.mxu3 %v177_v52 }
  0x21   :  { %149 = vmatpush.msra.mxu2 %v114_v22 }
  0x22   :  { %207 = vmatpush.msra.mxu3 %v176_v53 }
  0x24   :  { %208 = vmatpush.msra.mxu3 %v175_v54 }
  0x26   :  { %209 = vmatpush.msra.mxu3 %v174_v56 }
  0x81   :  { %v62_v20 = vpop.f32.mrf.mxu0 }
  0x82   :  { %v86_v23 = vpop.f32.mrf.mxu1 }
  0x83   :  { %v87_v24 = vadd.f32 %v86_v23, %v62_v20 }
  0x85   :  { %v93_v25 = vadd.f32 %v224_v21, %v87_v24 }
  0x87   :  { %v222_v26 = vmul.f32 -1.442695, %v93_v25 }
  0x89   :  { %227 = vpow2.f32 %v222_v26 }
  0x8f   :  { %v228_v27 = vpop.eup %227 }
  0x90   :  { %v97_v28 = vadd.f32 1.0, %v228_v27 }
  0x92   :  { %229 = vrcp.f32 %v97_v28  ;;  %v109_v32 = vand.u32 2147483648, %v97_v28  ;;  %v107_v34 = vand.u32 2147483647, %v97_v28  ;;  %vm103_vm4 = vweird.f32 %v97_v28 }
  0x94   :  { %v110_v36 = vor.u32 1.1754944e-38, %v109_v32  ;;  %vm108_vm6 = vcmp.eq.f32.partialorder %v107_v34, 8.507059e+37 }
  0x98   :  { %v230_v29 = vpop.eup %229 }
  0x99   :  { %v99_v30 = vmul.f32 %v230_v29, %v97_v28  ;;  %vm104_vm3 = vweird.f32 %v230_v29 }
  0x9a   :  { %vm105_vm5 = vmor %vm103_vm4, %vm104_vm3 }
  0x9b   :  { %v100_v31 = vsub.f32 1.0, %v99_v30 }
  0x9d   :  { %v101_v33 = vmul.f32 %v230_v29, %v100_v31 }
  0x9f   :  { %v102_v35 = vadd.f32 %v230_v29, %v101_v33 }
  0xa1   :  { %v106_v37 = vsel %vm105_vm5, %v230_v29, %v102_v35 }
  0xa2   :  { %v111_v38 = vsel %vm108_vm6, %v110_v36, %v106_v37 }
  0xa3   :  { %v113_v39 = vmul.f32 %v111_v38, %v93_v25 }
  0xa5   :  { %150 = vmatmul.f32.vlgmr.msra.gmra.mxu2 %v113_v39 }
 0x128   :  { %v151_v57 = vpop.f32.mrf.mxu2 }
 0x129   :  { %v152_v58 = vadd.f32 %v225_v55, %v151_v57 }
 0x12b   :  { %v223_v59 = vmul.f32 -1.442695, %v152_v58 }
 0x12d   :  { %231 = vpow2.f32 %v223_v59 }
 0x133   :  { %v232_v60 = vpop.eup %231 }
 0x134   :  { %v157_v61 = vadd.f32 1.0, %v232_v60 }
 0x136   :  { %233 = vrcp.f32 %v157_v61  ;;  %v169_v1 = vand.u32 2147483648, %v157_v61  ;;  %v167_v3 = vand.u32 2147483647, %v157_v61  ;;  %vm163_vm8 = vweird.f32 %v157_v61 }
 0x138   :  { %v170_v5 = vor.u32 1.1754944e-38, %v169_v1  ;;  %vm168_vm10 = vcmp.eq.f32.partialorder %v167_v3, 8.507059e+37 }
 0x13c   :  { %v234_v62 = vpop.eup %233 }
 0x13d   :  { %v159_v63 = vmul.f32 %v234_v62, %v157_v61  ;;  %vm164_vm7 = vweird.f32 %v234_v62 }
 0x13e   :  { %vm165_vm9 = vmor %vm163_vm8, %vm164_vm7 }
 0x13f   :  { %v160_v0 = vsub.f32 1.0, %v159_v63 }
 0x141   :  { %v161_v2 = vmul.f32 %v234_v62, %v160_v0 }
 0x143   :  { %v162_v4 = vadd.f32 %v234_v62, %v161_v2 }
 0x145   :  { %v166_v6 = vsel %vm165_vm9, %v234_v62, %v162_v4 }
 0x146   :  { %v171_v7 = vsel %vm168_vm10, %v170_v5, %v166_v6 }
 0x147   :  { %v173_v8 = vmul.f32 %v171_v7, %v152_v58 }
 0x149   :  { %210 = vmatmul.f32.vlgmr.msra.gmra.mxu3 %v173_v8 }
 0x1cc   :  { %v211_v10 = vpop.f32.mrf.mxu3 }
 0x1cd   :  { %v212_v11 = vadd.f32 %v226_v9, %v211_v10 }
 0x1cf   :  { %214 = vst.msk [vmem:[%s419_s9] sm:$0xff] %vm65_vm2, %v212_v11 }

</bundles_post_ra>
